<compile_context>
chip_gen: v7x
topology: tpu7x:2x2x1
jax: 0.10.0
libtpu: 0.0.40
codegen_flags: <defaults>
</compile_context>

<pallas_src>
import numpy as np
import jax
import jax.numpy as jnp
from jax import lax
from jax.experimental import pallas as pl
from jax.experimental.pallas import tpu as pltpu


# ----------------------------------------------------------------------------
# Fused kernel: L x (Conv1d 'same' + per-channel scale/shift [+ tanh])
# ----------------------------------------------------------------------------
def _make_fused_kernel(L, K, T, Cpad, pad, tanh_mask):
    """Kernel processing one batch-block through all L layers in VMEM."""

    def kernel(x_ref, w_ref, ss_ref, o_ref, xp_ref):
        # x_ref:  (Bb, T, Cpad)          bf16, channels lane-padded
        # w_ref:  (L, K, Cpad, Cpad)     bf16, one (Cpad, Cpad) tile per tap
        # ss_ref: (L, 2, Cpad)           f32, row 0 = scale, row 1 = shift
        # o_ref:  (Bb, T, Cpad)          f32, lane-dense store
        # xp_ref: (Bb, T + 2*pad, Cpad)  bf16 VMEM scratch (padded activation)
        Bb = x_ref.shape[0]

        # Zero the time halos ONCE (scratch persists across grid steps and
        # interior writes never touch the halo rows).
        if pad > 0:
            @pl.when(pl.program_id(0) == 0)
            def _init_halos():
                xp_ref[:, :pad, :] = jnp.zeros((Bb, pad, Cpad), xp_ref.dtype)
                xp_ref[:, pad + T:, :] = jnp.zeros((Bb, pad, Cpad), xp_ref.dtype)

        # Load this batch-block's input into the scratch interior (bf16).
        xp_ref[:, pad:pad + T, :] = x_ref[...].astype(xp_ref.dtype)

        for l in range(L):                                   # static unroll (L small)
            # K shifted-view matmuls, f32 accumulation on the MXU.
            acc = jnp.zeros((Bb * T, Cpad), jnp.float32)
            for k in range(K):                               # static unroll (K small)
                lhs = xp_ref[:, k:k + T, :].reshape(Bb * T, Cpad)   # bf16 view load
                acc = acc + jnp.dot(lhs, w_ref[l, k, :, :],
                                    preferred_element_type=jnp.float32)
            scale = ss_ref[l, 0:1, :]                        # (1, Cpad) f32
            shift = ss_ref[l, 1:2, :]                        # (1, Cpad) f32
            y = acc * scale + shift                          # f32 epilogue (VPU)
            if tanh_mask[l]:
                y = jnp.tanh(y)                              # EUP
            y = y.reshape(Bb, T, Cpad)
            if l + 1 < L:
                # Next layer's input: write back into the scratch interior.
                xp_ref[:, pad:pad + T, :] = y.astype(xp_ref.dtype)
            else:
                o_ref[...] = y.astype(o_ref.dtype)           # lane-dense store

    return kernel


def _choose_batch_block(B, T, target_m=128):
    """Pick Bb so the matmul M = Bb*T is reasonably large while preferring
    >= 2 grid steps (megacore sharding on v7x)."""
    divisors = [d for d in range(1, B + 1) if B % d == 0]
    for d in divisors:                       # smallest Bb reaching target M, grid >= 2
        if d * T >= target_m and B // d >= 2:
            return d
    for d in divisors:                       # reaching target M at all
        if d * T >= target_m:
            return d
    for d in reversed(divisors):             # can't reach target: keep 2 grid steps
        if B // d >= 2:
            return d
    return B


def _vmem_limit_bytes(Bb, T, Cpad, K, L, pad):
    """Size the scoped VMEM limit from actual block sizes (with headroom),
    capped at ~3/4 of the chip's VMEM (64 MiB on v7x, 128 MiB on v5e/v6e)."""
    x_block = 2 * Bb * T * Cpad * 2            # bf16 input, double-buffered
    o_block = 2 * Bb * T * Cpad * 4            # f32 output, double-buffered
    w_block = 1 * L * K * Cpad * Cpad * 2      # bf16 weights, single-buffered
    ss_block = 1 * L * 2 * Cpad * 4
    scratch = Bb * (T + 2 * pad) * Cpad * 2    # padded activation scratch (bf16)
    temps = 4 * Bb * T * Cpad * 4              # acc + epilogue temporaries (generous)
    need = x_block + o_block + w_block + ss_block + scratch + temps
    need = int(need * 1.5) + (4 << 20)
    try:
        cap = int(pltpu.get_tpu_info().vmem_capacity_bytes) * 3 // 4
    except Exception:
        cap = 48 * 1024 * 1024                 # safe on all generations incl. v7x
    return max(min(need, cap), min(32 * 1024 * 1024, cap))


def fused_conv_stack(x, w_all, ss_all, tanh_mask, *, batch_block=None):
    """x: (B, T, Cpad) (any float dtype; cast to bf16 here, channels lane-padded);
    w_all: (L, K, Cpad, Cpad) bf16; ss_all: (L, 2, Cpad) f32.
    Returns (B, T, Cpad) f32."""
    B, T, Cpad = x.shape
    L, K, Cp1, Cp2 = w_all.shape
    assert Cp1 == Cpad and Cp2 == Cpad
    pad = (K - 1) // 2

    if batch_block is None:
        batch_block = _choose_batch_block(B, T)
    assert B % batch_block == 0
    Bb = batch_block
    grid = (B // Bb,)

    x = x.astype(jnp.bfloat16)  # halve input DMA; the MXU consumes bf16 anyway

    kernel = _make_fused_kernel(L, K, T, Cpad, pad,
                                tuple(bool(t) for t in tanh_mask))

    flops = 2 * B * T * Cpad * Cpad * K * L
    transcendentals = int(sum(bool(t) for t in tanh_mask)) * B * T * Cpad
    bytes_accessed = (x.size * x.dtype.itemsize
                      + w_all.size * w_all.dtype.itemsize
                      + ss_all.size * ss_all.dtype.itemsize
                      + B * T * Cpad * 4)

    # TODO(synk): for very long sequences on v7x (64 MiB VMEM), tile T with an
    # L*pad halo instead of holding all T in one block; not needed at these sizes.
    return pl.pallas_call(
        kernel,
        out_shape=jax.ShapeDtypeStruct((B, T, Cpad), jnp.float32),
        grid=grid,
        in_specs=[
            pl.BlockSpec((Bb, T, Cpad), lambda i: (i, 0, 0)),
            # Grid-invariant operands: single-buffer to halve their VMEM cost.
            pl.BlockSpec((L, K, Cpad, Cpad), lambda i: (0, 0, 0, 0),
                         pipeline_mode=pl.Buffered(1)),
            pl.BlockSpec((L, 2, Cpad), lambda i: (0, 0, 0),
                         pipeline_mode=pl.Buffered(1)),
        ],
        out_specs=pl.BlockSpec((Bb, T, Cpad), lambda i: (i, 0, 0)),
        scratch_shapes=[pltpu.VMEM((Bb, T + 2 * pad, Cpad), jnp.bfloat16)],
        compiler_params=pltpu.CompilerParams(
            dimension_semantics=("parallel",),
            vmem_limit_bytes=_vmem_limit_bytes(Bb, T, Cpad, K, L, pad)),
        cost_estimate=pl.CostEstimate(flops=flops,
                                      transcendentals=transcendentals,
                                      bytes_accessed=bytes_accessed),
    )(x, w_all, ss_all)


# ----------------------------------------------------------------------------
# Parameter packing: pad channels to the lane width, one (Cpad,Cpad) tile/tap
# ----------------------------------------------------------------------------
def pack_layers(layer_params, Cpad, weight_dtype=jnp.bfloat16):
    """layer_params: list of dicts with w:(K,Cin,Cout), scale:(Cout,), shift:(Cout,).
    Returns w_all (L, K, Cpad, Cpad) in weight_dtype and ss_all (L, 2, Cpad) f32.
    Padded channels carry zero weight/scale/shift so zeros propagate exactly."""
    ws, sss = [], []
    K0 = layer_params[0]["w"].shape[0]
    for p in layer_params:
        K, cin, cout = p["w"].shape
        assert K == K0
        wp = jnp.zeros((K, Cpad, Cpad), jnp.float32)
        wp = wp.at[:, :cin, :cout].set(p["w"].astype(jnp.float32))
        ws.append(wp)
        sc = jnp.zeros((Cpad,), jnp.float32).at[:cout].set(p["scale"].astype(jnp.float32))
        sh = jnp.zeros((Cpad,), jnp.float32).at[:cout].set(p["shift"].astype(jnp.float32))
        sss.append(jnp.stack([sc, sh], axis=0))
    w_all = jnp.stack(ws, axis=0).astype(weight_dtype)   # (L, K, Cpad, Cpad)
    ss_all = jnp.stack(sss, axis=0)                      # (L, 2, Cpad) f32
    return w_all, ss_all


# ----------------------------------------------------------------------------
# ConvNorm.forward (the original module): Conv1d with 'same' padding and bias
# ----------------------------------------------------------------------------
def convnorm_forward(signal, w, b, *, batch_block=None, weight_dtype=jnp.bfloat16):
    """signal: (B, Cin, T) like the PyTorch module (NCL). w: (K, Cin, Cout) 'LIO'.
    Returns (B, Cout, T)."""
    B, Cin, T = signal.shape
    K, _, Cout = w.shape
    x = jnp.transpose(signal, (0, 2, 1))                 # NCL -> NLC (channels on lanes)
    Cpad = 128 * int(pl.cdiv(max(Cin, Cout), 128))       # do NOT pad beyond next 128
    x_p = jnp.pad(x, ((0, 0), (0, 0), (0, Cpad - Cin)))  # one-time lane pad of the input
    layer = dict(w=w,
                 scale=jnp.ones((Cout,), jnp.float32),   # identity "norm": pure Conv1d
                 shift=b.astype(jnp.float32))            # conv bias
    w_all, ss_all = pack_layers([layer], Cpad, weight_dtype)
    out = fused_conv_stack(x_p, w_all, ss_all, tanh_mask=(False,),
                           batch_block=batch_block)
    return jnp.transpose(out[:, :, :Cout], (0, 2, 1))    # back to NCL


def convnorm_reference(signal, w, b):
    K = w.shape[0]
    pad = (K - 1) // 2
    x = jnp.transpose(signal, (0, 2, 1))
    y = lax.conv_general_dilated(x, w, window_strides=(1,), padding=[(pad, pad)],
                                 dimension_numbers=("NLC", "LIO", "NLC"))
    y = y + b[None, None, :]
    return jnp.transpose(y, (0, 2, 1))


# ----------------------------------------------------------------------------
# PostNet: 5 x (ConvNorm + eval-mode BatchNorm), tanh after the first 4 layers
# ----------------------------------------------------------------------------
def init_postnet_params(key, n_mel, embed_dim, kernel_size, n_convs):
    """Deterministic synthetic parameters (not a checkpoint load)."""
    layers = []
    dims = [n_mel] + [embed_dim] * (n_convs - 1) + [n_mel]
    for i in range(n_convs):
        cin, cout = dims[i], dims[i + 1]
        key, k_w, k_b, k_g, k_be, k_m, k_v = jax.random.split(key, 7)
        w = jax.random.normal(k_w, (kernel_size, cin, cout), jnp.float32) * 0.05
        b = jax.random.normal(k_b, (cout,), jnp.float32) * 0.05
        gamma = 1.0 + 0.1 * jax.random.normal(k_g, (cout,), jnp.float32)
        beta = 0.1 * jax.random.normal(k_be, (cout,), jnp.float32)
        running_mean = 0.1 * jax.random.normal(k_m, (cout,), jnp.float32)
        running_var = 1.0 + 0.1 * jax.random.uniform(k_v, (cout,), jnp.float32)
        eps = 1e-5
        scale = gamma / jnp.sqrt(running_var + eps)
        shift = (b - running_mean) * scale + beta
        layers.append(dict(w=w, scale=scale, shift=shift))
    return layers


def postnet_forward(x, params, *, batch_block=None, weight_dtype=jnp.bfloat16):
    """x: (B, T, n_mel) channels-last. Whole 5-layer stack runs in ONE kernel."""
    B, T, Cin0 = x.shape
    L = len(params)
    maxC = max(max(p["w"].shape[1], p["w"].shape[2]) for p in params)
    Cpad = 128 * int(pl.cdiv(max(maxC, Cin0), 128))
    x_p = jnp.pad(x, ((0, 0), (0, 0), (0, Cpad - Cin0)))   # one-time lane pad (input only)
    w_all, ss_all = pack_layers(params, Cpad, weight_dtype)
    tanh_mask = tuple(i < L - 1 for i in range(L))
    out = fused_conv_stack(x_p, w_all, ss_all, tanh_mask, batch_block=batch_block)
    n_out = params[-1]["w"].shape[2]
    # TODO(synk): F.dropout(0.5, training=True) has no deterministic Pallas
    # equivalent here; eval-mode semantics (dropout = identity) are reproduced.
    return out[:, :, :n_out]


def postnet_reference(x, params):
    """Pure-JAX reference (lax.conv_general_dilated, f32) for correctness check."""
    n = len(params)
    for i, p in enumerate(params):
        K = p["w"].shape[0]
        pad = (K - 1) // 2
        y = lax.conv_general_dilated(
            x, p["w"], window_strides=(1,), padding=[(pad, pad)],
            dimension_numbers=("NLC", "LIO", "NLC"))
        y = y * p["scale"][None, None, :] + p["shift"][None, None, :]
        if i < n - 1:
            y = jnp.tanh(y)
        x = y
    return x


if __name__ == "__main__":
    key = jax.random.PRNGKey(0)

    # ---- 1) ConvNorm.forward (the original module spec): one Conv1d ----------
    B, Cin, T, Cout, K = 2, 16, 16, 64, 5
    key, k_x, k_w, k_b = jax.random.split(key, 4)
    signal = jax.random.normal(k_x, (B, Cin, T), jnp.float32)     # NCL like PyTorch
    w = jax.random.normal(k_w, (K, Cin, Cout), jnp.float32) * 0.05
    b = jax.random.normal(k_b, (Cout,), jnp.float32) * 0.05

    out1 = jax.block_until_ready(convnorm_forward(signal, w, b))
    ref1 = jax.block_until_ready(convnorm_reference(signal, w, b))
    assert out1.shape == (B, Cout, T), out1.shape
    # bf16 matmul operands / bf16 activations (f32 accumulation) -> loosened tol
    np.testing.assert_allclose(np.asarray(out1), np.asarray(ref1),
                               rtol=2e-2, atol=2e-2)

    # ---- 2) PostNet stack of ConvNorm+BN(+tanh), fully fused in one kernel ---
    n_mel, embed_dim, n_convs = 16, 64, 5
    key, k_x2 = jax.random.split(key)
    x = jax.random.normal(k_x2, (B, T, n_mel), jnp.float32)
    params = init_postnet_params(key, n_mel, embed_dim, K, n_convs)

    out2 = jax.block_until_ready(postnet_forward(x, params))
    ref2 = jax.block_until_ready(postnet_reference(x, params))
    assert out2.shape == (B, T, n_mel), out2.shape
    np.testing.assert_allclose(np.asarray(out2), np.asarray(ref2),
                               rtol=5e-2, atol=5e-2)

    print("KERNEL_OK")
</pallas_src>

<mosaic_0001>
module attributes {stable_mosaic.version = 11 : i64} {
  func.func @kernel(%arg0: i32, %arg1: memref<1x16x128xbf16, #tpu.memory_space<vmem>>, %arg2: memref<1x5x128x128xbf16, #tpu.memory_space<vmem>>, %arg3: memref<1x2x128xf32, #tpu.memory_space<vmem>>, %arg4: memref<1x16x128xf32, #tpu.memory_space<vmem>>, %arg5: memref<1x20x128xbf16, #tpu.memory_space<vmem>>) attributes {dimension_semantics = [#tpu.dimension_semantics<parallel>], iteration_bounds = array<i64: 2>, scalar_prefetch = 0 : i64, scratch_operands = 1 : i64, tpu.core_type = #tpu.core_type<tc>, window_params = [{transform_indices = @transform_0, window_bounds = array<i64: 1, 16, 128>}, {pipeline_mode = #tpu.pipeline_mode<synchronous>, transform_indices = @transform_1, window_bounds = array<i64: 1, 5, 128, 128>}, {pipeline_mode = #tpu.pipeline_mode<synchronous>, transform_indices = @transform_2, window_bounds = array<i64: 1, 2, 128>}, {transform_indices = @transform_3, window_bounds = array<i64: 1, 16, 128>}]} {
    %c0_i32 = arith.constant 0 : i32
    %0 = arith.cmpi eq, %arg0, %c0_i32 : i32
    %1 = arith.extui %0 : i1 to i32
    %c0_i32_0 = arith.constant 0 : i32
    %2 = arith.cmpi ne, %1, %c0_i32_0 : i32
    scf.if %2 {
      %cst_51 = arith.constant 0.000000e+00 : bf16
      %46 = vector.broadcast %cst_51 : bf16 to vector<1x2x128xbf16>
      %c0_52 = arith.constant 0 : index
      %c0_53 = arith.constant 0 : index
      %c0_54 = arith.constant 0 : index
      %47 = vector.load %arg5[%c0_52, %c0_53, %c0_54] : memref<1x20x128xbf16, #tpu.memory_space<vmem>>, vector<1x2x128xbf16>
      tpu.vector_store %arg5[%c0_52, %c0_53, %c0_54], %46 {strides = array<i32>} : memref<1x20x128xbf16, #tpu.memory_space<vmem>>, vector<1x2x128xbf16>,
      %cst_55 = arith.constant 0.000000e+00 : bf16
      %48 = vector.broadcast %cst_55 : bf16 to vector<1x2x128xbf16>
      %c0_56 = arith.constant 0 : index
      %c18 = arith.constant 18 : index
      %c0_57 = arith.constant 0 : index
      %49 = vector.load %arg5[%c0_56, %c18, %c0_57] : memref<1x20x128xbf16, #tpu.memory_space<vmem>>, vector<1x2x128xbf16>
      tpu.vector_store %arg5[%c0_56, %c18, %c0_57], %48 {strides = array<i32>} : memref<1x20x128xbf16, #tpu.memory_space<vmem>>, vector<1x2x128xbf16>,
    } else {
    }
    %c0 = arith.constant 0 : index
    %c0_1 = arith.constant 0 : index
    %c0_2 = arith.constant 0 : index
    %3 = vector.load %arg1[%c0, %c0_1, %c0_2] : memref<1x16x128xbf16, #tpu.memory_space<vmem>>, vector<1x16x128xbf16>
    %c0_3 = arith.constant 0 : index
    %c2 = arith.constant 2 : index
    %c0_4 = arith.constant 0 : index
    %4 = vector.load %arg5[%c0_3, %c2, %c0_4] : memref<1x20x128xbf16, #tpu.memory_space<vmem>>, vector<1x16x128xbf16>
    tpu.vector_store %arg5[%c0_3, %c2, %c0_4], %3 {strides = array<i32>} : memref<1x20x128xbf16, #tpu.memory_space<vmem>>, vector<1x16x128xbf16>,
    %cst = arith.constant 0.000000e+00 : f32
    %5 = vector.broadcast %cst : f32 to vector<16x128xf32>
    %c0_5 = arith.constant 0 : index
    %c0_6 = arith.constant 0 : index
    %c0_7 = arith.constant 0 : index
    %6 = vector.load %arg5[%c0_5, %c0_6, %c0_7] : memref<1x20x128xbf16, #tpu.memory_space<vmem>>, vector<1x16x128xbf16>
    %7 = vector.shape_cast %6 : vector<1x16x128xbf16> to vector<16x128xbf16>
    %c0_8 = arith.constant 0 : index
    %c0_9 = arith.constant 0 : index
    %c0_10 = arith.constant 0 : index
    %c0_11 = arith.constant 0 : index
    %8 = vector.load %arg2[%c0_8, %c0_9, %c0_10, %c0_11] : memref<1x5x128x128xbf16, #tpu.memory_space<vmem>>, vector<1x1x128x128xbf16>
    %9 = vector.shape_cast %8 : vector<1x1x128x128xbf16> to vector<128x128xbf16>
    %cst_12 = arith.constant dense<0.000000e+00> : vector<16x128xf32>
    %10 = tpu.matmul %7, %9, %cst_12 {dimension_numbers = #tpu.dot_dimension_numbers<[1], [0], [0], [1], [0, 0, 1, 1], [], []>} : vector<16x128xbf16>, vector<128x128xbf16>, vector<16x128xf32> -> vector<16x128xf32>
    %11 = arith.addf %5, %10 : vector<16x128xf32>
    %c0_13 = arith.constant 0 : index
    %c1 = arith.constant 1 : index
    %c0_14 = arith.constant 0 : index
    %12 = vector.load %arg5[%c0_13, %c1, %c0_14] : memref<1x20x128xbf16, #tpu.memory_space<vmem>>, vector<1x16x128xbf16>
    %13 = vector.shape_cast %12 : vector<1x16x128xbf16> to vector<16x128xbf16>
    %c0_15 = arith.constant 0 : index
    %c1_16 = arith.constant 1 : index
    %c0_17 = arith.constant 0 : index
    %c0_18 = arith.constant 0 : index
    %14 = vector.load %arg2[%c0_15, %c1_16, %c0_17, %c0_18] : memref<1x5x128x128xbf16, #tpu.memory_space<vmem>>, vector<1x1x128x128xbf16>
    %15 = vector.shape_cast %14 : vector<1x1x128x128xbf16> to vector<128x128xbf16>
    %cst_19 = arith.constant dense<0.000000e+00> : vector<16x128xf32>
    %16 = tpu.matmul %13, %15, %cst_19 {dimension_numbers = #tpu.dot_dimension_numbers<[1], [0], [0], [1], [0, 0, 1, 1], [], []>} : vector<16x128xbf16>, vector<128x128xbf16>, vector<16x128xf32> -> vector<16x128xf32>
    %17 = arith.addf %11, %16 : vector<16x128xf32>
    %c0_20 = arith.constant 0 : index
    %c2_21 = arith.constant 2 : index
    %c0_22 = arith.constant 0 : index
    %18 = vector.load %arg5[%c0_20, %c2_21, %c0_22] : memref<1x20x128xbf16, #tpu.memory_space<vmem>>, vector<1x16x128xbf16>
    %19 = vector.shape_cast %18 : vector<1x16x128xbf16> to vector<16x128xbf16>
    %c0_23 = arith.constant 0 : index
    %c2_24 = arith.constant 2 : index
    %c0_25 = arith.constant 0 : index
    %c0_26 = arith.constant 0 : index
    %20 = vector.load %arg2[%c0_23, %c2_24, %c0_25, %c0_26] : memref<1x5x128x128xbf16, #tpu.memory_space<vmem>>, vector<1x1x128x128xbf16>
    %21 = vector.shape_cast %20 : vector<1x1x128x128xbf16> to vector<128x128xbf16>
    %cst_27 = arith.constant dense<0.000000e+00> : vector<16x128xf32>
    %22 = tpu.matmul %19, %21, %cst_27 {dimension_numbers = #tpu.dot_dimension_numbers<[1], [0], [0], [1], [0, 0, 1, 1], [], []>} : vector<16x128xbf16>, vector<128x128xbf16>, vector<16x128xf32> -> vector<16x128xf32>
    %23 = arith.addf %17, %22 : vector<16x128xf32>
    %c0_28 = arith.constant 0 : index
    %c3 = arith.constant 3 : index
    %c0_29 = arith.constant 0 : index
    %24 = vector.load %arg5[%c0_28, %c3, %c0_29] : memref<1x20x128xbf16, #tpu.memory_space<vmem>>, vector<1x16x128xbf16>
    %25 = vector.shape_cast %24 : vector<1x16x128xbf16> to vector<16x128xbf16>
    %c0_30 = arith.constant 0 : index
    %c3_31 = arith.constant 3 : index
    %c0_32 = arith.constant 0 : index
    %c0_33 = arith.constant 0 : index
    %26 = vector.load %arg2[%c0_30, %c3_31, %c0_32, %c0_33] : memref<1x5x128x128xbf16, #tpu.memory_space<vmem>>, vector<1x1x128x128xbf16>
    %27 = vector.shape_cast %26 : vector<1x1x128x128xbf16> to vector<128x128xbf16>
    %cst_34 = arith.constant dense<0.000000e+00> : vector<16x128xf32>
    %28 = tpu.matmul %25, %27, %cst_34 {dimension_numbers = #tpu.dot_dimension_numbers<[1], [0], [0], [1], [0, 0, 1, 1], [], []>} : vector<16x128xbf16>, vector<128x128xbf16>, vector<16x128xf32> -> vector<16x128xf32>
    %29 = arith.addf %23, %28 : vector<16x128xf32>
    %c0_35 = arith.constant 0 : index
    %c4 = arith.constant 4 : index
    %c0_36 = arith.constant 0 : index
    %30 = vector.load %arg5[%c0_35, %c4, %c0_36] : memref<1x20x128xbf16, #tpu.memory_space<vmem>>, vector<1x16x128xbf16>
    %31 = vector.shape_cast %30 : vector<1x16x128xbf16> to vector<16x128xbf16>
    %c0_37 = arith.constant 0 : index
    %c4_38 = arith.constant 4 : index
    %c0_39 = arith.constant 0 : index
    %c0_40 = arith.constant 0 : index
    %32 = vector.load %arg2[%c0_37, %c4_38, %c0_39, %c0_40] : memref<1x5x128x128xbf16, #tpu.memory_space<vmem>>, vector<1x1x128x128xbf16>
    %33 = vector.shape_cast %32 : vector<1x1x128x128xbf16> to vector<128x128xbf16>
    %cst_41 = arith.constant dense<0.000000e+00> : vector<16x128xf32>
    %34 = tpu.matmul %31, %33, %cst_41 {dimension_numbers = #tpu.dot_dimension_numbers<[1], [0], [0], [1], [0, 0, 1, 1], [], []>} : vector<16x128xbf16>, vector<128x128xbf16>, vector<16x128xf32> -> vector<16x128xf32>
    %35 = arith.addf %29, %34 : vector<16x128xf32>
    %c0_42 = arith.constant 0 : index
    %c0_43 = arith.constant 0 : index
    %c0_44 = arith.constant 0 : index
    %36 = vector.load %arg3[%c0_42, %c0_43, %c0_44] : memref<1x2x128xf32, #tpu.memory_space<vmem>>, vector<1x1x128xf32>
    %37 = vector.shape_cast %36 : vector<1x1x128xf32> to vector<1x128xf32>
    %c0_45 = arith.constant 0 : index
    %c1_46 = arith.constant 1 : index
    %c0_47 = arith.constant 0 : index
    %38 = vector.load %arg3[%c0_45, %c1_46, %c0_47] : memref<1x2x128xf32, #tpu.memory_space<vmem>>, vector<1x1x128xf32>
    %39 = vector.shape_cast %38 : vector<1x1x128xf32> to vector<1x128xf32>
    %40 = vector.broadcast %37 : vector<1x128xf32> to vector<16x128xf32>
    %41 = arith.mulf %35, %40 : vector<16x128xf32>
    %42 = vector.broadcast %39 : vector<1x128xf32> to vector<16x128xf32>
    %43 = arith.addf %41, %42 : vector<16x128xf32>
    %44 = vector.shape_cast %43 : vector<16x128xf32> to vector<1x16x128xf32>
    %c0_48 = arith.constant 0 : index
    %c0_49 = arith.constant 0 : index
    %c0_50 = arith.constant 0 : index
    %45 = vector.load %arg4[%c0_48, %c0_49, %c0_50] : memref<1x16x128xf32, #tpu.memory_space<vmem>>, vector<1x16x128xf32>
    tpu.vector_store %arg4[%c0_48, %c0_49, %c0_50], %44 {strides = array<i32>} : memref<1x16x128xf32, #tpu.memory_space<vmem>>, vector<1x16x128xf32>,
    return
  }
  func.func @transform_0(%arg0: i32) -> (i32, i32, i32) {
    %c0_i32 = arith.constant 0 : i32
    %c0_i32_0 = arith.constant 0 : i32
    %c0_i32_1 = arith.constant 0 : i32
    return %arg0, %c0_i32, %c0_i32_0 : i32, i32, i32
  }
  func.func @transform_1(%arg0: i32) -> (i32, i32, i32, i32) {
    %c0_i32 = arith.constant 0 : i32
    %c0_i32_0 = arith.constant 0 : i32
    %c0_i32_1 = arith.constant 0 : i32
    %c0_i32_2 = arith.constant 0 : i32
    %c0_i32_3 = arith.constant 0 : i32
    return %c0_i32, %c0_i32_0, %c0_i32_1, %c0_i32_2 : i32, i32, i32, i32
  }
  func.func @transform_2(%arg0: i32) -> (i32, i32, i32) {
    %c0_i32 = arith.constant 0 : i32
    %c0_i32_0 = arith.constant 0 : i32
    %c0_i32_1 = arith.constant 0 : i32
    %c0_i32_2 = arith.constant 0 : i32
    return %c0_i32, %c0_i32_0, %c0_i32_1 : i32, i32, i32
  }
  func.func @transform_3(%arg0: i32) -> (i32, i32, i32) {
    %c0_i32 = arith.constant 0 : i32
    %c0_i32_0 = arith.constant 0 : i32
    %c0_i32_1 = arith.constant 0 : i32
    return %arg0, %c0_i32, %c0_i32_0 : i32, i32, i32
  }
}

</mosaic_0001>

<bundles_post_ra>
// kernel: tpu_custom_call.1
= control target key start
LH: loop header
LB: loop body
LE: loop exit
PB: predicated region body
PF: predicated region fallthrough
CT: control target
= control target key end

     0   :  { %8 = vsyncpa [#allocation4], 0  ;;  %s1729_s0 = inlined_call_operand.hbm [shape: bf16[2,16,128], index: 0, kind: input, shape index: {}]   ;;  %s1730_s1 = inlined_call_operand.hbm [shape: bf16[1,5,128,128], index: 1, kind: input, shape index: {}]   ;;  %s1731_s2 = inlined_call_operand.vmem [shape: f32[1,2,128], index: 2, kind: input, shape index: {}]   ;;  %s1732_s3 = inlined_call_operand.hbm [shape: f32[2,16,128], index: 3, kind: output, shape index: {}]  }
   0x1   :  { %10 = vsyncpa [#allocation4 + $0x1], 0 }
   0x2   :  { %11 = vsyncpa [#allocation7], 0 }
   0x3   :  { %12 = vsyncpa [#allocation5], 0 }
   0x4   :  { %14 = vsyncpa [#allocation5 + $0x1], 0  ;;  %s1438_s12 = smov 0   ;;  %s1440_s13 = smov 0  }
   0x5   :  { %s1442_s14 = smov 0   ;;  %s1444_s15 = smov 0  }
   0x6 LB: > { %s1459_s16 = sadd.s32 4294967295, %s1406_s15   ;;  %s944_s17 = sadd.s32 4294967294, %s1406_s15   ;;  %s1406_s15 = sphi %s1444_s15, %s1753_s15   ;;  %s1402_s14 = sphi %s1442_s14, %s1752_s14   ;;  %s1398_s13 = sphi %s1440_s13, %s1751_s13   ;;  %s1394_s12 = sphi %s1438_s12, %s1750_s12  }
   0x7   : > { %p40_p0 = scmp.ne.s32.totalorder %s1398_s13, %s1394_s12  ;;  %p1733_p1 = scmp.eq.s32.totalorder %s1459_s16, 0 }
   0x8   : > { %p112_p3 = scmp.eq.s32.totalorder %s944_s17, 1  ;;  %p945_p5 = scmp.ge.s32.totalorder %s1406_s15, 1 }
   0x9   : > { %p1468_p4 = por %p1733_p1, %p40_p0  ;;  %p119_p7 = scmp.lt.s32.totalorder %s1406_s15, 3 }
   0xa   : > { %p1473_p6 = por %p112_p3, %p40_p0  ;;  %s1408_s21 = smov [#allocation6]  }
   0xb   : > { %s1736_s18 = scalar_select %p1468_p4, 1, 0 }
   0xc   : > { %s1737_s19 = scalar_select %p1473_p6, 1, 0 }
   0xd   : > { %p1479_p9 = pnand %p945_p5, %p119_p7  ;;  %s131_s22 = sshll.u32 %s1408_s21, 4  ;;  %s1483_s22 = int_to_ptr.vmem [resolvable:$true] %s131_s22 }
   0xe   : > { %s1495_s24 = sadd.s32 1, %s1406_s15   ;;  %s27_s25 = sadd.s32 1, %s1402_s14 }
   0xf   : > { %s1738_s20 = scalar_select %p1479_p9, 1, 0 }
  0x10   : > { %p1177_p10 = pneg %p1479_p9  ;;  %s24_s26 = ssub.s32 %s1406_s15, %s1495_s24 }
  0x11   : > { %s1278_s29 = scalar_lea.hbm %s1730_s1, 5120 }
  0x12   : > { %p1490_p12 = pnand %p1177_p10, %p1733_p1  ;;  %p1279_p13 = scmp.ne.s32.totalorder %s1730_s1, %s1278_s29 }
  0x13   : > { %p1285_p7 = scmp.lt.u32.totalorder %s1278_s29, %s1730_s1 }
  0x14   : > { %p1280_p0 = pneg %p1490_p12 }
  0x16   : > { %p1281_p3 = pnand %p1280_p0, %p1279_p13 }
  0x18   : > { %p1282_p5 = pneg %p1281_p3 }
  0x1a   : > { %p1287_p10 = pnand %p1285_p7, %p1282_p5 }
  0x1c   : > { %1290 = shalt.err (!%p1287_p10)
}
  0x1d   : > { %s1291_s7 = scalar_lea.vmem %s1483_s22, 5120  ;;  %p1299_p2 = scmp.lt.s32.totalorder %s1483_s22, %s1483_s22 }
  0x1e   : > { %p1292_p11 = scmp.ne.s32.totalorder %s1483_s22, %s1291_s7  ;;  %p1300_p6 = scmp.lt.s32.totalorder %s1291_s7, %s1291_s7 }
  0x20   : > { %p1294_p8 = pnand %p1292_p11, %p1280_p0  ;;  %p1301_p4 = por %p1300_p6, %p1299_p2 }
  0x22   : > { %p1295_p1 = pneg %p1294_p8 }
  0x24   : > { %p1302_p9 = pnand %p1301_p4, %p1295_p1 }
  0x26   : > { %1305 = shalt.err (!%p1302_p9)
}
  0x27   : > { %s1409_s8 = smov 64   ;;  %s1410_s9 = smov 4  }
  0x28   : > { %1180 = dma.hbm_to_vmem [thread:$0]  (!%p1490_p12), %s1730_s1, 5120, %s1483_s22, [#allocation7], %s1409_s8, %s1409_s8, %s1410_s9  }
  0x29   : > { %p25_p1 = scmp.eq.s32.totalorder %s24_s26, 0  ;;  %p34_p2 = scmp.ne.s32.totalorder %s1402_s14, %s1398_s13 }
  0x2a   : > { %p35_p4 = scmp.eq.s32.totalorder %s1406_s15, 0  ;;  %p1190_p6 = scmp.lt.s32.totalorder %s1406_s15, 2 }
  0x2b   : > { %s1529_s17 = scalar_select %p25_p1, %s1402_s14, %s27_s25  }
  0x2c   : > { %p36_p8 = por %p35_p4, %p34_p2  ;;  %p1740_p9 = scmp.eq.s32.totalorder %s1459_s16, 1 }
  0x2d   : > { %s148_s23 = sand.u32 1, %s1402_s14   ;;  %s1008_s27 = sshll.u32 %s1406_s15, 7 }
  0x2e   : > { %p1533_p11 = por %p1740_p9, %p34_p2  ;;  %s948_s28 = sshll.u32 %s148_s23, 3 }
  0x2f   : > { %s1542_s4 = scalar_lea.hbm %s1729_s0, %s1008_s27  ;;  %s152_s22 = scalar_lea.vmem [#allocation3], %s948_s28 }
  0x30   : > { %s159_s25 = sshll.u32 %s152_s22, 4  ;;  %p1544_p12 = pnand %p1190_p6, %p36_p8  ;;  %s1548_s25 = int_to_ptr.vmem [resolvable:$true] %s159_s25 }
  0x31   : > { %s1550_s5 = scalar_lea.sflag [#allocation4], %s148_s23  ;;  %s1306_s6 = scalar_lea.hbm %s1542_s4, 128 }
  0x32   : > { %p1307_p13 = scmp.ne.s32.totalorder %s1542_s4, %s1306_s6  ;;  %p1308_p0 = pneg %p1544_p12 }
  0x33   : > { %s1311_s11 = scalar_lea.hbm %s1729_s0, 256  ;;  %p1312_p7 = scmp.lt.u32.totalorder %s1542_s4, %s1729_s0 }
  0x34   : > { %p1309_p3 = pnand %p1308_p0, %p1307_p13  ;;  %p1313_p10 = scmp.lt.u32.totalorder %s1311_s11, %s1306_s6 }
  0x35   : > { %p1315_p2 = scmp.lt.u32.totalorder %s1306_s6, %s1542_s4 }
  0x36   : > { %p1310_p5 = pneg %p1309_p3  ;;  %p1314_p1 = por %p1313_p10, %p1312_p7 }
  0x38   : > { %p1316_p4 = por %p1315_p2, %p1314_p1 }
  0x3a   : > { %p1317_p6 = pnand %p1316_p4, %p1310_p5 }
  0x3c   : > { %1320 = shalt.err (!%p1317_p6)
}
  0x3d   : > { %s1321_s23 = scalar_lea.vmem %s1548_s25, 128  ;;  %s1411_s29 = smov [#allocation3]  }
  0x3e   : > { %p1322_p8 = scmp.ne.s32.totalorder %s1548_s25, %s1321_s23  ;;  %s1326_s30 = sshll.u32 %s1411_s29, 4  ;;  %s1327_s30 = int_to_ptr.vmem [resolvable:$false] %s1326_s30 }
  0x3f   : > { %s1328_s22 = scalar_lea.vmem %s1327_s30, 256  ;;  %p1329_p3 = scmp.lt.s32.totalorder %s1548_s25, %s1327_s30 }
  0x40   : > { %p1324_p9 = pnand %p1322_p8, %p1308_p0  ;;  %p1330_p7 = scmp.lt.s32.totalorder %s1328_s22, %s1321_s23 }
  0x42   : > { %p1325_p13 = pneg %p1324_p9  ;;  %p1331_p10 = por %p1330_p7, %p1329_p3 }
  0x44   : > { %p1332_p1 = pnand %p1331_p10, %p1325_p13 }
  0x46   : > { %1335 = shalt.err (!%p1332_p1)
}
  0x47   : > { %1184 = dma.hbm_to_vmem [thread:$0]  (!%p1544_p12), %s1542_s4, 128, %s1548_s25, %s1550_s5, %s1409_s8, %s1409_s8, %s1410_s9  }
  0x48   : > { %p1743_p0 = scmp.ne.s32.totalorder %s1738_s20, 0 }
  0x49   : > { %s1584_s6 = sand.u32 (!%p1743_p0), 1, %s1398_s13   ;;  %p1744_p5 = scmp.ne.s32.totalorder (!%p1743_p0), %s1736_s18, 0 }
  0x4a   : > { %171 = sbr.rel (%p1743_p0) target bundleno = 427 (0x1ab), region = 32  ;;  %s952_s7 = sshll.u32 (!%p1743_p0), %s1584_s6, 3 }
  0x4b   : > { %s174_s10 = scalar_lea.sflag (!%p1743_p0), [#allocation4], %s1584_s6  ;;  %s1588_s11 = scalar_lea.vmem (!%p1743_p0), [#allocation3], %s952_s7 }
  0x51   : > { %1381 = dma.done.wait (%p1744_p5), %s174_s10, 128  }
  0x52   : > { %1383 = vsyncadd (%p1744_p5), %s174_s10, 4294967168  ;;  %p1745_p12 = scmp.eq.s32.totalorder %s1459_s16, 0 }
  0x54   : > { %1385 = dma.done.wait (%p1745_p12), [#allocation7], 5120   ;;  %p1746_p2 = pmov %p1745_p12 }
  0x55   : > { %s954_s20 = sshll.u32 %s1584_s6, 4  ;;  %p1747_p4 = scmp.ne.s32.totalorder %s1459_s16, 0 }
  0x56   : > { %1387 = vsyncadd (%p1746_p2), [#allocation7], 4294962176  ;;  %s1599_s8 = scalar_lea.vmem [#allocation8], %s954_s20  ;;  %v1412_v0 = vmov (!%p1747_p4), 0  }
  0x57   : > { %208 = sbr.rel (%p1747_p4) target bundleno = 94 (0x5e), region = 44  ;;  %209 = vst [vmem:[#allocation2] sm:$0x1] (!%p1747_p4), %v1412_v0 }
  0x5e PF: > { %v1233_v1 = vld [vmem:[#allocation6 + $0x40] sm:$0xff]   ;;  %v1413_v2 = vmov 0.0   ;;  %v1235_v4 = vld [vmem:[#allocation6 + $0x48] sm:$0xff]   ;;  %vm1414_vm0 = vmmov 0   ;;  %v1237_v6 = vld [vmem:[#allocation6 + $0x50] sm:$0xff]   ;;  %vm215_vm1 = vcmask 1040384  }
  0x5f   : > { %1055 = vmatprep.subr.bf16.mxu1 %v1413_v2  ;;  %1095 = vmatprep.subr.bf16.mxu0 %v1413_v2  ;;  %v1234_v3 = vld [vmem:[#allocation6 + $0x80] sm:$0xff]   ;;  %v1236_v5 = vld [vmem:[#allocation6 + $0x88] sm:$0xff]   ;;  %v1238_v7 = vld [vmem:[#allocation6 + $0x90] sm:$0xff]   ;;  %vm216_vm2 = vcmask 1044484   ;;  %vm487_vm4 = vcmask 1046528   ;;  %vm735_vm7 = vcmask 1045504  }
  0x60   : > { %1056 = vmatpush3.bf16.msra.mxu1 %v1233_v1  ;;  %1071 = vmatprep.mubr.msk.bf16.mxu1 %vm1414_vm0, %v1413_v2  ;;  %v1239_v8 = vld [vmem:[#allocation6 + $0x58] sm:$0xff]   ;;  %v1241_v10 = vld [vmem:[#allocation6 + $0x60] sm:$0xff]   ;;  %v1243_v12 = vld [vmem:[#allocation6 + $0x68] sm:$0xff]   ;;  %vm273_vm5 = vsmask.f32 7424  ;;  %s1009_s26 = sshll.u32 %s1459_s16, 8 }
  0x61   : > { %1096 = vmatpush3.bf16.msra.mxu0 %v1234_v3  ;;  %1057 = vmatprep.subr.bf16.mxu1 %v1413_v2  ;;  %v1240_v9 = vld [vmem:[#allocation6 + $0x98] sm:$0xff]   ;;  %v1242_v11 = vld [vmem:[#allocation6 + $0xa0] sm:$0xff]   ;;  %vm217_vm3 = vmor %vm215_vm1, %vm216_vm2  ;;  %vm604_vm6 = vsmask.f32 6400  ;;  %s861_s5 = sshll.u32 %s1599_s8, 4  ;;  %s1681_s23 = scalar_lea.hbm %s1732_s3, %s1009_s26  ;;  %s1683_s5 = int_to_ptr.vmem [resolvable:$true] %s861_s5 }
  0x62   : > { %1097 = vmatprep.subr.bf16.mxu0 %v1413_v2  ;;  %1111 = vmatprep.mubr.msk.bf16.mxu0 %vm1414_vm0, %v1413_v2  ;;  %v211_v13 = vld [vmem:[%s1588_s11] sm:$0xf]  ;;  %v212_v14 = vld [vmem:[%s1588_s11 + $0x4] sm:$0xf]  ;;  %v1244_v17 = vld [vmem:[#allocation6 + $0xa8] sm:$0xff]   ;;  %s848_s29 = scalar_lea.sflag [#allocation5], %s1584_s6 }
  0x63   : > { %v218_v15 = vrot.slane %v211_v13, 7  ;;  %v220_v16 = vrot.slane %v212_v14, 7  ;;  %v1245_v21 = vld [vmem:[#allocation6 + $0x70] sm:$0xff]   ;;  %v1247_v23 = vld [vmem:[#allocation6 + $0x78] sm:$0xff]   ;;  %v1253_v36 = vld [vmem:[#allocation6 + $0xc0] sm:$0xff]   ;;  %s1336_s30 = scalar_lea.vmem %s1683_s5, 256 }
  0x64   : > { %1058 = vmatpush3.bf16.msra.mxu1 %v1235_v4  ;;  %v1246_v22 = vld [vmem:[#allocation6 + $0xb0] sm:$0xff]   ;;  %v1248_v24 = vld [vmem:[#allocation6 + $0xb8] sm:$0xff]   ;;  %v1251_v41 = vld [vmem:[#allocation6] sm:$0xff]   ;;  %p1337_p6 = scmp.ne.s32.totalorder %s1683_s5, %s1336_s30  ;;  %s1415_s16 = smov [#allocation8]  }
  0x65   : > { %1098 = vmatpush3.bf16.msra.mxu0 %v1236_v5  ;;  %1059 = vmatprep.subr.bf16.mxu1 %v1413_v2  ;;  %v219_v18 = vrot.slane %v218_v15, 4  ;;  %v222_v19 = vrot.slane %v220_v16, 4  ;;  %226 = vst [vmem:[#allocation2] sm:$0xe] %v218_v15  ;;  %v1255_v42 = vld [vmem:[#allocation6 + $0xc8] sm:$0xff]   ;;  %v1257_v45 = vld [vmem:[#allocation6 + $0xd0] sm:$0xff]  }
  0x66   : > { %1099 = vmatprep.subr.bf16.mxu0 %v1413_v2  ;;  %v1254_v44 = vld [vmem:[#allocation6 + $0x8] sm:$0xff]   ;;  %v1256_v46 = vld [vmem:[#allocation6 + $0x10] sm:$0xff]   ;;  %v1259_v47 = vld [vmem:[#allocation6 + $0xd8] sm:$0xff]   ;;  %p1338_p8 = pnand %p1337_p6, %p1533_p11  ;;  %s1340_s22 = sshll.u32 %s1415_s16, 4  ;;  %s1341_s22 = int_to_ptr.vmem [resolvable:$false] %s1340_s22 }
  0x67   : > { %v221_v20 = vsel %vm217_vm3, %v219_v18, %v220_v16  ;;  %228 = vst [vmem:[#allocation2 + $0x8] sm:$0x1] %v222_v19  ;;  %v1258_v48 = vld [vmem:[#allocation6 + $0x18] sm:$0xff]   ;;  %v1261_v49 = vld [vmem:[#allocation6 + $0xe0] sm:$0xff]   ;;  %v1263_v52 = vld [vmem:[#allocation6 + $0xe8] sm:$0xff]   ;;  %s1342_s7 = scalar_lea.vmem %s1341_s22, 512  ;;  %p1343_p13 = scmp.lt.s32.totalorder %s1683_s5, %s1341_s22 }
  0x68   : > { %1060 = vmatpush3.bf16.msra.mxu1 %v1237_v6  ;;  %227 = vst [vmem:[#allocation2 + $0x4] sm:$0xf] %v221_v20  ;;  %v1260_v51 = vld [vmem:[#allocation6 + $0x20] sm:$0xff]   ;;  %v1262_v57 = vld [vmem:[#allocation6 + $0x28] sm:$0xff]   ;;  %v1265_v58 = vld [vmem:[#allocation6 + $0xf0] sm:$0xff]   ;;  %p1339_p9 = pneg %p1338_p8  ;;  %p1344_p3 = scmp.lt.s32.totalorder %s1342_s7, %s1336_s30 }
  0x69   : > { %1100 = vmatpush3.bf16.msra.mxu0 %v1238_v7  ;;  %1061 = vmatprep.subr.bf16.mxu1 %v1413_v2  ;;  %v1264_v63 = vld [vmem:[#allocation6 + $0x30] sm:$0xff]   ;;  %v1267_v0 = vld [vmem:[#allocation6 + $0xf8] sm:$0xff]   ;;  %v1269_v6 = vld [vmem:[#allocation6 + $0x100] sm:$0xff]  }
  0x6a   : > { %1101 = vmatprep.subr.bf16.mxu0 %v1413_v2  ;;  %v1266_v4 = vld [vmem:[#allocation6 + $0x38] sm:$0xff]   ;;  %v1270_v7 = vld [vmem:[#allocation6 + $0x108] sm:$0xff]   ;;  %v1275_v13 = vld [vmem:[#allocation6 + $0x130] sm:$0xff]   ;;  %p1345_p7 = por %p1344_p3, %p1343_p13 }
  0x6b   : > { %v1276_v15 = vld [vmem:[#allocation6 + $0x138] sm:$0xff]  }
  0x6c   : > { %1062 = vmatpush3.bf16.msra.mxu1 %v1239_v8  ;;  %v229_v25 = vld [vmem:[#allocation2] sm:$0xf]  ;;  %v1271_v8 = vld [vmem:[#allocation6 + $0x110] sm:$0xff]   ;;  %p1346_p10 = pnand %p1345_p7, %p1339_p9 }
  0x6d   : > { %1102 = vmatpush3.bf16.msra.mxu0 %v1240_v9  ;;  %1063 = vmatprep.subr.bf16.mxu1 %v1413_v2  ;;  %v466_v26 = vld [vmem:[#allocation2] sm:$0xe]  ;;  %v1272_v9 = vld [vmem:[#allocation6 + $0x118] sm:$0xff]  }
  0x6e   : > { %1103 = vmatprep.subr.bf16.mxu0 %v1413_v2  ;;  %v1250_v27 = vld [vmem:[#allocation2 + $0x8] ss:$0 sps:$4 sm:$0x11]  }
  0x6f   : > { %v1625_v28 = vld [vmem:[#allocation2 + $0x4] sm:$0xf]  ;;  %v282_v30 = vshll.u32 %v1250_v27, 16  ;;  %v489_v32 = vrot.slane %v1250_v27, 1 }
  0x70   : > { %1064 = vmatpush3.bf16.msra.mxu1 %v1241_v10  ;;  %v1628_v29 = vcombine.low %v229_v25, %v1625_v28  ;;  %v974_v31 = vcombine.low %v466_v26, %v1625_v28  ;;  %v1644_v50 = vld [vmem:[#allocation2 + $0x8] ss:$0 sps:$4 sm:$0x33]   ;;  %v1273_v10 = vld [vmem:[#allocation6 + $0x120] sm:$0xff]  }
  0x71   : > { %1104 = vmatpush3.bf16.msra.mxu0 %v1242_v11  ;;  %1065 = vmatprep.subr.bf16.mxu1 %v1413_v2  ;;  %v284_v38 = vrot.slane %v282_v30, 1  ;;  %v614_v55 = vshrl.u32 %v1644_v50, 16  ;;  %v617_v56 = vshll.u32 %v1644_v50, 16  ;;  %v1274_v11 = vld [vmem:[#allocation6 + $0x128] sm:$0xff]   ;;  %v1002_v26 = vld [vmem:[%s1731_s2 + $0x1] ss:$0 sm:$0xff] }
  0x72   : > { %1105 = vmatprep.subr.bf16.mxu0 %v1413_v2  ;;  %v275_v33 = vshrl.u32 %v1628_v29, 16  ;;  %v277_v34 = vshll.u32 %v1628_v29, 16  ;;  %v488_v35 = vrot.slane %v974_v31, 1  ;;  %v606_v53 = vshrl.u32 %v974_v31, 16 }
  0x73   : > { %v609_v54 = vshll.u32 %v974_v31, 16  ;;  %v616_v61 = vrot.slane %v614_v55, 1  ;;  %v619_v62 = vrot.slane %v617_v56, 2 }
  0x74   : > { %1066 = vmatpush3.bf16.msra.mxu1 %v1243_v12  ;;  %v279_v37 = vrot.slane %v277_v34, 1  ;;  %v490_v39 = vsel %vm487_vm4, %v488_v35, %v489_v32  ;;  %v608_v59 = vrot.slane %v606_v53, 1  ;;  %v714_v12 = vld [vmem:[#allocation2] sm:$0xc] }
  0x75   : > { %1106 = vmatpush3.bf16.msra.mxu0 %v1244_v17  ;;  %1067 = vmatprep.subr.bf16.mxu1 %v1413_v2  ;;  %v611_v60 = vrot.slane %v609_v54, 2  ;;  %v620_v3 = vor.u32 %v619_v62, %v616_v61  ;;  %v992_v14 = vcombine.low %v714_v12, %v1625_v28  ;;  %v737_v17 = vrot.slane %v1644_v50, 2 }
  0x76   : > { %1107 = vmatprep.subr.bf16.mxu0 %v1413_v2  ;;  %v280_v40 = vor.u32 %v279_v37, %v275_v33 }
  0x77   : > { %v612_v1 = vor.u32 %v611_v60, %v608_v59  ;;  %v736_v16 = vrot.slane %v992_v14, 2 }
  0x78   : > { %1068 = vmatpush3.bf16.msra.mxu1 %v1245_v21  ;;  %v285_v43 = vsel %vm273_vm5, %v280_v40, %v284_v38 }
  0x79   : > { %1108 = vmatpush3.bf16.msra.mxu0 %v1246_v22  ;;  %1069 = vmatprep.subr.bf16.mxu1 %v1413_v2  ;;  %v621_v5 = vsel %vm604_vm6, %v612_v1, %v620_v3  ;;  %v738_v18 = vsel %vm735_vm7, %v736_v16, %v737_v17 }
  0x7a   : > { %1109 = vmatprep.subr.bf16.mxu0 %v1413_v2 }
  0x7c   : > { %1070 = vmatpush3.bf16.msra.mxu1 %v1247_v23 }
  0x7d   : > { %1110 = vmatpush3.bf16.msra.mxu0 %v1248_v24  ;;  %1075 = vmatprep.subr.bf16.mxu1 %v1413_v2  ;;  %v1001_v24 = vld [vmem:[%s1731_s2] ss:$0 sm:$0xff] }
  0x7e   : > { %1115 = vmatprep.subr.bf16.mxu0 %v1413_v2 }
  0x7f   : > { %1072 = vmatmul.mubr.bf16.vlgmr.msra.gmra.mrb[0].mxu1 %v285_v43 }
  0x80   : > { %1112 = vmatmul.mubr.bf16.vlgmr.msra.gmra.mrb[0].mxu0 %v490_v39  ;;  %1076 = vmatpush3.bf16.msra.mxu1 %v1251_v41 }
  0x81   : > { %1116 = vmatpush3.bf16.msra.mxu0 %v1253_v36  ;;  %1131 = vmatprep.mubr.msk.bf16.mxu0 %vm1414_vm0, %v1413_v2 }
  0x82   : > { %1117 = vmatprep.subr.bf16.mxu0 %v1413_v2  ;;  %1077 = vmatprep.subr.bf16.mxu1 %v1413_v2 }
  0x83   : > { %1091 = vmatprep.mubr.msk.bf16.mxu1 %vm1414_vm0, %v1413_v2 }
  0x84   : > { %1078 = vmatpush3.bf16.msra.mxu1 %v1254_v44 }
  0x85   : > { %1118 = vmatpush3.bf16.msra.mxu0 %v1255_v42  ;;  %1079 = vmatprep.subr.bf16.mxu1 %v1413_v2 }
  0x86   : > { %1119 = vmatprep.subr.bf16.mxu0 %v1413_v2 }
  0x88   : > { %1080 = vmatpush3.bf16.msra.mxu1 %v1256_v46 }
  0x89   : > { %1120 = vmatpush3.bf16.msra.mxu0 %v1257_v45  ;;  %1081 = vmatprep.subr.bf16.mxu1 %v1413_v2 }
  0x8a   : > { %1121 = vmatprep.subr.bf16.mxu0 %v1413_v2 }
  0x8c   : > { %1082 = vmatpush3.bf16.msra.mxu1 %v1258_v48 }
  0x8d   : > { %1122 = vmatpush3.bf16.msra.mxu0 %v1259_v47  ;;  %1083 = vmatprep.subr.bf16.mxu1 %v1413_v2 }
  0x8e   : > { %1123 = vmatprep.subr.bf16.mxu0 %v1413_v2 }
  0x90   : > { %1084 = vmatpush3.bf16.msra.mxu1 %v1260_v51 }
  0x91   : > { %1124 = vmatpush3.bf16.msra.mxu0 %v1261_v49  ;;  %1085 = vmatprep.subr.bf16.mxu1 %v1413_v2 }
  0x92   : > { %1125 = vmatprep.subr.bf16.mxu0 %v1413_v2 }
  0x94   : > { %1086 = vmatpush3.bf16.msra.mxu1 %v1262_v57 }
  0x95   : > { %1126 = vmatpush3.bf16.msra.mxu0 %v1263_v52  ;;  %1087 = vmatprep.subr.bf16.mxu1 %v1413_v2 }
  0x96   : > { %1127 = vmatprep.subr.bf16.mxu0 %v1413_v2 }
  0x98   : > { %1088 = vmatpush3.bf16.msra.mxu1 %v1264_v63 }
  0x99   : > { %1128 = vmatpush3.bf16.msra.mxu0 %v1265_v58  ;;  %1089 = vmatprep.subr.bf16.mxu1 %v1413_v2 }
  0x9a   : > { %1129 = vmatprep.subr.bf16.mxu0 %v1413_v2 }
  0x9c   : > { %1090 = vmatpush3.bf16.msra.mxu1 %v1266_v4 }
  0x9d   : > { %1130 = vmatpush3.bf16.msra.mxu0 %v1267_v0 }
  0x9e   : > { %1135 = vmatprep.subr.bf16.mxu0 %v1413_v2 }
  0x9f   : > { %1092 = vmatmul.mubr.bf16.vlgmr.msra.gmra.mrb[0].mxu1 %v1628_v29 }
  0xa0   : > { %1132 = vmatmul.mubr.bf16.vlgmr.msra.gmra.mrb[0].mxu0 %v621_v5 }
  0xa1   : > { %1136 = vmatpush3.bf16.msra.mxu0 %v1269_v6  ;;  %1151 = vmatprep.mubr.msk.bf16.mxu0 %vm1414_vm0, %v1413_v2 }
  0xa2   : > { %1137 = vmatprep.subr.bf16.mxu0 %v1413_v2 }
  0xa5   : > { %1138 = vmatpush3.bf16.msra.mxu0 %v1270_v7 }
  0xa6   : > { %1139 = vmatprep.subr.bf16.mxu0 %v1413_v2 }
  0xa9   : > { %1140 = vmatpush3.bf16.msra.mxu0 %v1271_v8 }
  0xaa   : > { %1141 = vmatprep.subr.bf16.mxu0 %v1413_v2 }
  0xad   : > { %1142 = vmatpush3.bf16.msra.mxu0 %v1272_v9 }
  0xae   : > { %1143 = vmatprep.subr.bf16.mxu0 %v1413_v2 }
  0xb1   : > { %1144 = vmatpush3.bf16.msra.mxu0 %v1273_v10 }
  0xb2   : > { %1145 = vmatprep.subr.bf16.mxu0 %v1413_v2 }
  0xb5   : > { %1146 = vmatpush3.bf16.msra.mxu0 %v1274_v11 }
  0xb6   : > { %1147 = vmatprep.subr.bf16.mxu0 %v1413_v2 }
  0xb9   : > { %1148 = vmatpush3.bf16.msra.mxu0 %v1275_v13 }
  0xba   : > { %1149 = vmatprep.subr.bf16.mxu0 %v1413_v2 }
  0xbd   : > { %1150 = vmatpush3.bf16.msra.mxu0 %v1276_v15 }
  0xc0   : > { %1152 = vmatmul.mubr.bf16.vlgmr.msra.gmra.mrb[0].mxu0 %v738_v18 }
 0x172   : > { %v459_v19 = vpop.f32.mrb[0].mxu1 }
 0x173   : > { %v1093_v20 = vpop.f32.mrb[1].mxu1 }
 0x174   : > { %v462_v21 = vpop.f32.mrb[2].mxu1 }
 0x175   : > { %v1094_v22 = vpop.f32.mrb[3].mxu1 }
 0x193   : > { %v822_v23 = vpop.f32.mrb[0].mxu0 }
 0x194   : > { %v1155_v25 = vadd.f32 %v822_v23, %v459_v19  ;;  %v1153_v2 = vpop.f32.mrb[1].mxu0 }
 0x195   : > { %v825_v27 = vpop.f32.mrb[2].mxu0 }
 0x196   : > { %v837_v28 = vmul.f32 %v1155_v25, %v1001_v24  ;;  %v1156_v29 = vadd.f32 %v825_v27, %v462_v21  ;;  %v1154_v30 = vpop.f32.mrb[3].mxu0 }
 0x198   : > { %v843_v31 = vadd.f32 %v1002_v26, %v837_v28  ;;  %v838_v32 = vmul.f32 %v1156_v29, %v1001_v24 }
 0x19a   : > { %845 = vst [vmem:[%s1599_s8] sm:$0xff] %v843_v31  ;;  %v844_v33 = vadd.f32 %v1002_v26, %v838_v32 }
 0x19c   : > { %846 = vst [vmem:[%s1599_s8 + $0x8] sm:$0xff] %v844_v33 }
 0x19d   : > { %1349 = shalt.err (!%p1346_p10)
}
 0x19e   : > { %s1350_s10 = scalar_lea.hbm %s1681_s23, 256  ;;  %s1354_s8 = scalar_lea.hbm %s1732_s3, 512 }
 0x19f   : > { %p1351_p1 = scmp.ne.s32.totalorder %s1681_s23, %s1350_s10  ;;  %p1355_p12 = scmp.lt.u32.totalorder %s1681_s23, %s1732_s3 }
 0x1a0   : > { %p1356_p2 = scmp.lt.u32.totalorder %s1354_s8, %s1350_s10  ;;  %p1358_p6 = scmp.lt.u32.totalorder %s1350_s10, %s1681_s23 }
 0x1a1   : > { %p1352_p0 = pnand %p1351_p1, %p1533_p11 }
 0x1a2   : > { %p1357_p4 = por %p1356_p2, %p1355_p12 }
 0x1a3   : > { %p1353_p5 = pneg %p1352_p0 }
 0x1a4   : > { %p1359_p8 = por %p1358_p6, %p1357_p4 }
 0x1a6   : > { %p1360_p9 = pnand %p1359_p8, %p1353_p5 }
 0x1a8   : > { %1363 = shalt.err (!%p1360_p9)
}
 0x1a9   : > { %s1416_s4 = smov 128   ;;  %s1417_s25 = smov 8  }
 0x1aa   : > { %1175 = dma.vmem_to_hbm [thread:$0]  (%p1533_p11), %s1683_s5, 256, %s1681_s23, %s848_s29, %s1416_s4, %s1416_s4, %s1417_s25  }
 0x1ab PF: > { %s876_s26 = sand.u32 1, %s1394_s12   ;;  %p1748_p13 = scmp.ne.s32.totalorder %s1737_s19, 0 }
 0x1ac   : > { %p1749_p3 = scmp.ge.s32.totalorder %s1406_s15, 2  ;;  %s877_s27 = scalar_lea.sflag [#allocation5], %s876_s26 }
 0x1ae   : > { %p1186_p7 = pnand %p1749_p3, %p1748_p13 }
 0x1b0   : > { %1389 = dma.done.wait (!%p1186_p7), %s877_s27, 256  }
 0x1b1   : > { %1391 = vsyncadd (!%p1186_p7), %s877_s27, 4294967040  ;;  %p17_p10 = scmp.ge.s32.totalorder %s1495_s24, 4   ;;  %s1750_s12 = smov %s1398_s13 }
 0x1b2   : > { %s1751_s13 = smov %s1402_s14  ;;  %s1752_s14 = smov %s1529_s17 }
 0x1b3   : > { %s1753_s15 = smov %s1495_s24  ;;  %19 = sbr.rel (!%p17_p10) target bundleno = 6 (0x6), region = 89 }
 0x1ba   :  { %882 = vsyncpa [#allocation4], 1 }
 0x1bb   :  { %884 = vsyncpa [#allocation4 + $0x1], 1 }
 0x1bc   :  { %885 = vsyncpa [#allocation7], 1 }
 0x1bd   :  { %886 = vsyncpa [#allocation5], 1 }
 0x1be   :  { %888 = vsyncpa [#allocation5 + $0x1], 1 }

</bundles_post_ra>
